<compile_context>
chip_gen: v5e
topology: v5e:2x2
jax: 0.10.0
libtpu: 0.0.40
codegen_flags: <defaults>
</compile_context>

<pallas_src>
import jax
import jax.numpy as jnp
from jax.experimental import pallas as pl
from jax.experimental.pallas import tpu as pltpu


def _round_up(n: int, m: int) -> int:
    return ((n + m - 1) // m) * m


def linear_kernel(w_ref, b_ref, x_ref, o_ref):
    # w_ref: SMEM [F]               (scalar-prefetched weights, f32)
    # b_ref: SMEM [1]               (scalar-prefetched bias, f32)
    # x_ref: VMEM [F, tile_rows, 128]   sublane/lane-dense, feature-major
    # o_ref: VMEM [tile_rows, 128]      dense output slab
    f = x_ref.shape[0]
    # VPU fused multiply-adds over the tiny, static feature dimension (f32 accumulation).
    acc = x_ref[0].astype(jnp.float32) * w_ref[0]
    for k in range(1, f):  # static unroll, F == 3
        acc = acc + x_ref[k].astype(jnp.float32) * w_ref[k]
    o_ref[...] = (acc + b_ref[0]).astype(o_ref.dtype)


def polynomial_regression_forward(x, weight, bias, *, max_tile_samples=512 * 1024):
    """Forward pass of nn.Linear(3, 1).

    Args:
      x:      [N, 3]  float32
      weight: [1, 3]  float32  (PyTorch convention: [out_features, in_features])
      bias:   [1]     float32
      max_tile_samples: samples per grid step; must be a multiple of 1024 (8 sublanes
                        x 128 lanes) so non-final tiles satisfy the (8, 128) constraint.
    Returns:
      [N, 1] float32
    """
    n, f = x.shape
    assert weight.shape == (1, f)
    assert max_tile_samples % (8 * 128) == 0, "max_tile_samples must be a multiple of 1024"

    # Pad N only up to the next multiple of 128 (lane width); ragged final grid block is
    # handled by Pallas' masked reads/writes.
    n_pad = _round_up(n, 128)
    if n_pad != n:
        x = jnp.pad(x, ((0, n_pad - n), (0, 0)))
    rows_total = n_pad // 128

    # Feature-major, sublane/lane-dense layout: x_t[k, r, l] = x[r*128 + l, k].
    x_t = x.reshape(rows_total, 128, f).transpose(2, 0, 1)   # [F, rows, 128]

    w = weight.reshape(f).astype(jnp.float32)                 # [F] -> SMEM
    b = bias.reshape(1).astype(jnp.float32)                   # [1] -> SMEM

    max_tile_rows = max_tile_samples // 128
    tile_rows = rows_total if rows_total <= max_tile_rows else max_tile_rows
    grid = (pl.cdiv(rows_total, tile_rows),)

    out_rows = pl.pallas_call(
        linear_kernel,
        out_shape=jax.ShapeDtypeStruct((rows_total, 128), x.dtype),
        grid_spec=pltpu.PrefetchScalarGridSpec(
            num_scalar_prefetch=2,                            # w, b land in SMEM
            grid=grid,
            in_specs=[
                pl.BlockSpec((f, tile_rows, 128), lambda i, w_ref, b_ref: (0, i, 0)),
            ],
            out_specs=pl.BlockSpec((tile_rows, 128), lambda i, w_ref, b_ref: (i, 0)),
        ),
        compiler_params=pltpu.CompilerParams(
            dimension_semantics=("parallel",),                # pure data-parallel over N
            vmem_limit_bytes=48 * 1024 * 1024,
        ),
        cost_estimate=pl.CostEstimate(
            flops=2 * f * n_pad,                              # ~6 flops / sample
            transcendentals=0,
            bytes_accessed=4 * (f + 1) * n_pad,               # ~16 bytes / sample
        ),
    )(w, b, x_t)

    # Restore PyTorch output shape [N, 1] (slice is a no-op when N is 128-aligned).
    return out_rows.reshape(n_pad)[:n].reshape(n, 1)


if __name__ == "__main__":
    key = jax.random.PRNGKey(0)
    k_x, k_w, k_b, k_x2 = jax.random.split(key, 4)

    N, F = 8, 3  # small demo batch of 8 samples, 3 polynomial features each

    x = jax.random.normal(k_x, (N, F), dtype=jnp.float32)

    # Deterministic nn.Linear-style init: U(-1/sqrt(fan_in), 1/sqrt(fan_in)).
    bound = 1.0 / jnp.sqrt(jnp.float32(F))
    weight = jax.random.uniform(k_w, (1, F), minval=-bound, maxval=bound,
                                dtype=jnp.float32)
    bias = jax.random.uniform(k_b, (1,), minval=-bound, maxval=bound,
                              dtype=jnp.float32)

    out = polynomial_regression_forward(x, weight, bias)
    out = jax.block_until_ready(out)

    ref = x @ weight.T + bias
    assert out.shape == (N, 1)
    assert jnp.allclose(out, ref, atol=1e-5, rtol=1e-5)

    # Extra check: non-aligned N with a multi-step grid (ragged final block) to exercise
    # tiling, padding and the dense 3-D layout.
    N2 = 2500
    x2 = jax.random.normal(k_x2, (N2, F), dtype=jnp.float32)
    out2 = jax.block_until_ready(
        polynomial_regression_forward(x2, weight, bias, max_tile_samples=1024))
    ref2 = x2 @ weight.T + bias
    assert out2.shape == (N2, 1)
    assert jnp.allclose(out2, ref2, atol=1e-5, rtol=1e-5)

    print("KERNEL_OK")
</pallas_src>

<mosaic_0001>
module attributes {stable_mosaic.version = 11 : i64} {
  func.func @linear_kernel(%arg0: i32, %arg1: memref<3xf32, #tpu.memory_space<smem>>, %arg2: memref<1xf32, #tpu.memory_space<smem>>, %arg3: memref<3x1x128xf32, #tpu.memory_space<vmem>>, %arg4: memref<1x128xf32, #tpu.memory_space<vmem>>) attributes {dimension_semantics = [#tpu.dimension_semantics<parallel>], iteration_bounds = array<i64: 1>, scalar_prefetch = 2 : i64, scratch_operands = 0 : i64, tpu.core_type = #tpu.core_type<tc>, window_params = [{transform_indices = @transform_0, window_bounds = array<i64: 3, 1, 128>}, {transform_indices = @transform_1, window_bounds = array<i64: 1, 128>}]} {
    %c0 = arith.constant 0 : index
    %c0_0 = arith.constant 0 : index
    %c0_1 = arith.constant 0 : index
    %0 = vector.load %arg3[%c0, %c0_0, %c0_1] : memref<3x1x128xf32, #tpu.memory_space<vmem>>, vector<1x1x128xf32>
    %1 = vector.shape_cast %0 : vector<1x1x128xf32> to vector<1x128xf32>
    %c0_2 = arith.constant 0 : index
    %2 = memref.load %arg1[%c0_2] : memref<3xf32, #tpu.memory_space<smem>>
    %3 = vector.broadcast %2 : f32 to vector<1x128xf32>
    %4 = arith.mulf %1, %3 : vector<1x128xf32>
    %c1 = arith.constant 1 : index
    %c0_3 = arith.constant 0 : index
    %c0_4 = arith.constant 0 : index
    %5 = vector.load %arg3[%c1, %c0_3, %c0_4] : memref<3x1x128xf32, #tpu.memory_space<vmem>>, vector<1x1x128xf32>
    %6 = vector.shape_cast %5 : vector<1x1x128xf32> to vector<1x128xf32>
    %c1_5 = arith.constant 1 : index
    %7 = memref.load %arg1[%c1_5] : memref<3xf32, #tpu.memory_space<smem>>
    %8 = vector.broadcast %7 : f32 to vector<1x128xf32>
    %9 = arith.mulf %6, %8 : vector<1x128xf32>
    %10 = arith.addf %4, %9 : vector<1x128xf32>
    %c2 = arith.constant 2 : index
    %c0_6 = arith.constant 0 : index
    %c0_7 = arith.constant 0 : index
    %11 = vector.load %arg3[%c2, %c0_6, %c0_7] : memref<3x1x128xf32, #tpu.memory_space<vmem>>, vector<1x1x128xf32>
    %12 = vector.shape_cast %11 : vector<1x1x128xf32> to vector<1x128xf32>
    %c2_8 = arith.constant 2 : index
    %13 = memref.load %arg1[%c2_8] : memref<3xf32, #tpu.memory_space<smem>>
    %14 = vector.broadcast %13 : f32 to vector<1x128xf32>
    %15 = arith.mulf %12, %14 : vector<1x128xf32>
    %16 = arith.addf %10, %15 : vector<1x128xf32>
    %c0_9 = arith.constant 0 : index
    %17 = memref.load %arg2[%c0_9] : memref<1xf32, #tpu.memory_space<smem>>
    %18 = vector.broadcast %17 : f32 to vector<1x128xf32>
    %19 = arith.addf %16, %18 : vector<1x128xf32>
    %c0_10 = arith.constant 0 : index
    %c0_11 = arith.constant 0 : index
    %20 = vector.load %arg4[%c0_10, %c0_11] : memref<1x128xf32, #tpu.memory_space<vmem>>, vector<1x128xf32>
    tpu.vector_store %arg4[%c0_10, %c0_11], %19 {strides = array<i32>} : memref<1x128xf32, #tpu.memory_space<vmem>>, vector<1x128xf32>,
    return
  }
  func.func @transform_0(%arg0: i32, %arg1: memref<3xf32, #tpu.memory_space<smem>>, %arg2: memref<1xf32, #tpu.memory_space<smem>>) -> (i32, i32, i32) {
    %c0_i32 = arith.constant 0 : i32
    %c0_i32_0 = arith.constant 0 : i32
    %c0_i32_1 = arith.constant 0 : i32
    return %c0_i32, %arg0, %c0_i32_0 : i32, i32, i32
  }
  func.func @transform_1(%arg0: i32, %arg1: memref<3xf32, #tpu.memory_space<smem>>, %arg2: memref<1xf32, #tpu.memory_space<smem>>) -> (i32, i32) {
    %c0_i32 = arith.constant 0 : i32
    %c0_i32_0 = arith.constant 0 : i32
    return %arg0, %c0_i32 : i32, i32
  }
}

</mosaic_0001>

<bundles_post_ra>
// kernel: tpu_custom_call.1
= control target key start
LH: loop header
LB: loop body
LE: loop exit
PB: predicated region body
PF: predicated region fallthrough
CT: control target
= control target key end

     0   :  { %s146_s15 = smov [#allocation3]   ;;  %s183_s0 = inlined_call_operand.vmem [shape: f32[3], index: 0, kind: input, shape index: {}]   ;;  %s184_s1 = inlined_call_operand.<no memory space> [shape: f32[1], index: 1, kind: input, shape index: {}]   ;;  %s185_s2 = inlined_call_operand.hbm [shape: f32[3,1,128], index: 2, kind: input, shape index: {}]   ;;  %s186_s3 = inlined_call_operand.hbm [shape: f32[1,128], index: 3, kind: output, shape index: {}]  }
   0x1   :  { %s9_s14 = sshll.u32 %s183_s0, 4  ;;  %s10_s14 = int_to_ptr.vmem [resolvable:$true] %s9_s14 }
   0x2   :  { %12 = dma.vmem_to_smem %s10_s14, 16, %s146_s15, [#allocation2] }
   0x3   :  { %140 = dma.done.wait [#allocation2], 16 }
   0x4   :  { %141 = vsyncadd [#allocation2], 4294967280 }
   0x5   :  { %16 = sfence }
   0x6   :  { %17 = vsyncpa [#allocation6], 0 }
   0x7   :  { %18 = vsyncpa [#allocation7], 0  ;;  %s23_s18 = sshll.u32 %s185_s2, 4  ;;  %s147_s19 = smov [#allocation5]   ;;  %s24_s18 = int_to_ptr.hbm [resolvable:$true] %s23_s18 }
   0x8   :  { %s25_s20 = sshll.u32 %s147_s19, 4  ;;  %s148_s21 = smov 16   ;;  %s26_s20 = int_to_ptr.vmem [resolvable:$true] %s25_s20 }
   0x9   :  { %s149_s22 = smov 1  }
   0xa   :  { %31 = dma.hbm_to_vmem [thread:$0]  %s24_s18, 48, %s26_s20, [#allocation6], %s148_s21, %s148_s21, %s149_s22  }
   0xb   :  { %142 = dma.done.wait [#allocation6], 48  }
   0xc   :  { %143 = vsyncadd [#allocation6], 4294967248  ;;  %s37_s0 = sld [smem:[#allocation3]]  ;;  %v36_v0 = vld [vmem:[#allocation5] sm:$0x1]  ;;  %v53_v10 = vstv %s184_s1  ;;  %s150_s26 = smov [#allocation8]  }
   0xd   :  { %s73_s23 = sld [smem:[#allocation3 + $0x1]]  ;;  %v41_v2 = vld [vmem:[#allocation5 + $0x1] sm:$0x1]  ;;  %v47_v3 = vld [vmem:[#allocation5 + $0x2] sm:$0x1]  ;;  %s61_s27 = sshll.u32 %s150_s26, 4  ;;  %s62_s27 = int_to_ptr.vmem [resolvable:$true] %s61_s27 }
   0xe   :  { %s74_s24 = sld [smem:[#allocation3 + $0x2]]  ;;  %s63_s30 = sshll.u32 %s186_s3, 4  ;;  %s64_s30 = int_to_ptr.hbm [resolvable:$true] %s63_s30 }
  0x12   :  { %v38_v1 = vstv %s37_s0 }
  0x13   :  { %v39_v4 = vmul.f32 %v38_v1, %v36_v0  ;;  %v43_v5 = vstv %s73_s23 }
  0x14   :  { %v44_v6 = vmul.f32 %v43_v5, %v41_v2  ;;  %v49_v7 = vstv %s74_s24 }
  0x15   :  { %v50_v8 = vmul.f32 %v49_v7, %v47_v3 }
  0x16   :  { %v45_v9 = vadd.f32 %v44_v6, %v39_v4 }
  0x18   :  { %v51_v11 = vadd.f32 %v50_v8, %v45_v9 }
  0x1a   :  { %v54_v12 = vadd.f32 %v53_v10, %v51_v11 }
  0x1c   :  { %55 = vst [vmem:[#allocation8] sm:$0x1] %v54_v12 }
  0x1d   :  { %66 = dma.vmem_to_hbm [thread:$0]  %s62_s27, 16, %s64_s30, [#allocation7]  }
  0x1e   :  { %144 = dma.done.wait [#allocation7], 16  }
  0x1f   :  { %145 = vsyncadd [#allocation7], 4294967280 }
  0x20   :  { %71 = vsyncpa [#allocation6], 1 }
  0x21   :  { %72 = vsyncpa [#allocation7], 1 }

</bundles_post_ra>
